<compile_context>
chip_gen: v7x
topology: tpu7x:2x2x1
jax: 0.10.0
libtpu: 0.0.40
codegen_flags: <defaults>
</compile_context>

<pallas_src>
import math
import functools

import jax
import jax.numpy as jnp
from jax import lax
from jax.experimental import pallas as pl
from jax.experimental.pallas import tpu as pltpu

# Leave headroom on v7x (64 MiB VMEM per TC); v5e/v6e have 128 MiB and could go larger.
_VMEM_LIMIT = 48 * 1024 * 1024


def _pick_tile(dim, candidates):
    """Largest candidate tile that divides `dim`, else the full dim (always legal)."""
    for c in candidates:
        if dim % c == 0:
            return c
    return dim


# ----------------------------------------------------------------------------
# Generic tiled matmul kernel (bf16 inputs, f32 accumulation).
# ----------------------------------------------------------------------------
def _matmul_kernel(a_ref, b_ref, o_ref, acc_ref):
    @pl.when(pl.program_id(2) == 0)
    def _init():
        acc_ref[...] = jnp.zeros_like(acc_ref)

    acc_ref[...] += jnp.dot(a_ref[...], b_ref[...],
                            preferred_element_type=jnp.float32)

    @pl.when(pl.program_id(2) == pl.num_programs(2) - 1)
    def _finalize():
        o_ref[...] = acc_ref[...].astype(o_ref.dtype)


def _matmul(a, b, out_dtype):
    """a: (M, K), b: (K, N) (bf16) -> (M, N) out_dtype with f32 accumulation."""
    M, K = a.shape
    K2, N = b.shape
    assert K == K2
    # 512x1024 tiles -> ~341 FLOP/byte: compute-bound on v5e/v7x, close on v6e,
    # while keeping the double-buffered footprint (~10 MiB) well inside v7x's 64 MiB VMEM.
    tm = _pick_tile(M, (512, 256, 128, 64, 32, 16, 8))
    tn = _pick_tile(N, (1024, 512, 256, 128))
    tk = _pick_tile(K, (512, 256, 128))

    return pl.pallas_call(
        _matmul_kernel,
        out_shape=jax.ShapeDtypeStruct((M, N), out_dtype),
        grid_spec=pltpu.PrefetchScalarGridSpec(
            num_scalar_prefetch=0,
            grid=(M // tm, N // tn, K // tk),
            in_specs=[
                pl.BlockSpec((tm, tk), lambda i, j, k: (i, k)),
                pl.BlockSpec((tk, tn), lambda i, j, k: (k, j)),
            ],
            out_specs=pl.BlockSpec((tm, tn), lambda i, j, k: (i, j)),
            scratch_shapes=[pltpu.VMEM((tm, tn), jnp.float32)],
        ),
        compiler_params=pltpu.CompilerParams(
            dimension_semantics=("parallel", "parallel", "arbitrary"),
            vmem_limit_bytes=_VMEM_LIMIT,
        ),
    )(a, b)


# ----------------------------------------------------------------------------
# Flash-attention kernel: grid = (B, H, n_q_tiles); KV loop lives inside the kernel.
# ----------------------------------------------------------------------------
def _flash_attn_kernel(q_ref, k_ref, v_ref, o_ref, m_ref, l_ref, acc_ref, *,
                       blk, scale_inv):
    """One (batch, head, q-tile) grid step.

    q_ref        : (blk, d_k) bf16  -- current query tile.
    k_ref, v_ref : (S, d_k)  bf16  -- full-sequence K/V; their index_map ignores the
                                      q-tile axis so they stay VMEM-resident per (b, h)
                                      (K/V streamed from HBM once per head, not per q-tile).
    """
    qi = pl.program_id(2)
    dt = q_ref.dtype

    # Fold 1/sqrt(d_k) into Q once per q-tile (blk*d_k mults) instead of scaling the
    # (blk, blk) scores tile on every KV chunk.
    q = (q_ref[...].astype(jnp.float32) * scale_inv).astype(dt)

    m_ref[...] = jnp.full_like(m_ref, -jnp.inf)
    l_ref[...] = jnp.zeros_like(l_ref)
    acc_ref[...] = jnp.zeros_like(acc_ref)

    def step(ki, masked):
        start = pl.multiple_of(ki * blk, blk)
        k = k_ref[pl.ds(start, blk), :]
        v = v_ref[pl.ds(start, blk), :]
        # Q @ K^T on the MXU without materializing a transpose of K.
        s = lax.dot_general(q, k, dimension_numbers=(((1,), (1,)), ((), ())),
                            preferred_element_type=jnp.float32)
        if masked:
            # Diagonal chunk only: in-tile causal mask (matches masked_fill(mask==0, -1e9)).
            row = lax.broadcasted_iota(jnp.int32, s.shape, 0)
            col = lax.broadcasted_iota(jnp.int32, s.shape, 1)
            s = jnp.where(col <= row, s, jnp.float32(-1e9))
        m_prev = m_ref[...]
        m_new = jnp.maximum(m_prev, jnp.max(s, axis=-1, keepdims=True))
        alpha = jnp.exp(m_prev - m_new)
        p = jnp.exp(s - m_new)                                   # (blk, blk) f32
        l_ref[...] = alpha * l_ref[...] + jnp.sum(p, axis=-1, keepdims=True)
        acc_ref[...] = alpha * acc_ref[...] + jnp.dot(
            p.astype(dt), v, preferred_element_type=jnp.float32)
        m_ref[...] = m_new

    # Strictly sub-diagonal KV chunks: no mask work (no iota/compare/select on the VPU).
    def _unmasked_body(ki, carry):
        step(ki, masked=False)
        return carry

    lax.fori_loop(0, qi, _unmasked_body, 0)

    # Diagonal chunk: masked.  Every row keeps >= 1 live column, so l > 0.
    step(qi, masked=True)

    o_ref[...] = (acc_ref[...] * pl.reciprocal(l_ref[...])).astype(o_ref.dtype)


def _flash_call(kernel, grid, in_specs, out_spec, out_shape, blk, dk):
    return pl.pallas_call(
        kernel,
        out_shape=out_shape,
        grid_spec=pltpu.PrefetchScalarGridSpec(
            num_scalar_prefetch=0,
            grid=grid,
            in_specs=in_specs,
            out_specs=out_spec,
            scratch_shapes=[
                pltpu.VMEM((blk, 1), jnp.float32),    # running row max
                pltpu.VMEM((blk, 1), jnp.float32),    # running softmax denominator
                pltpu.VMEM((blk, dk), jnp.float32),   # unnormalized context accumulator
            ],
        ),
        compiler_params=pltpu.CompilerParams(
            # B/H are the balanced megacore-sharding axes; the causally-imbalanced
            # q-tile axis stays "arbitrary".
            dimension_semantics=("parallel", "parallel", "arbitrary"),
            vmem_limit_bytes=_VMEM_LIMIT,
        ),
    )


def _flash_attention_fused_layout(qkv, *, n_heads, scale_inv):
    """qkv: (B, S, 3*D) bf16 with columns [Q_h0..Q_h{H-1} | K_h0.. | V_h0..].

    Heads are addressed via BlockSpec index_map (no wrapper transposes); requires
    d_k % 128 == 0 so each head slice is lane-dense.  Output lands in (B, S, D) layout,
    ready for the output projection.
    TODO(synk): for very long S on v7x (K+V per head > ~16 MiB) switch the resident KV
    block back to chunked KV with pltpu.emit_pipeline.
    """
    B, S, threeD = qkv.shape
    D = threeD // 3
    dk = D // n_heads
    blk = _pick_tile(S, (512, 256, 128, 64, 32, 16, 8))
    kernel = functools.partial(_flash_attn_kernel, blk=blk, scale_inv=scale_inv)

    q_spec = pl.BlockSpec((None, blk, dk), lambda b, h, qi: (b, qi, h))
    k_spec = pl.BlockSpec((None, S, dk), lambda b, h, qi: (b, 0, n_heads + h))
    v_spec = pl.BlockSpec((None, S, dk), lambda b, h, qi: (b, 0, 2 * n_heads + h))
    o_spec = pl.BlockSpec((None, blk, dk), lambda b, h, qi: (b, qi, h))

    call = _flash_call(kernel, (B, n_heads, S // blk), [q_spec, k_spec, v_spec], o_spec,
                       jax.ShapeDtypeStruct((B, S, D), jnp.bfloat16), blk, dk)
    return call(qkv, qkv, qkv)


def _flash_attention_bhsd(q, k, v, *, scale_inv):
    """q, k, v: (B, H, S, d_k) bf16 -> (B, H, S, d_k) bf16.  Fallback for d_k < 128."""
    B, H, S, dk = q.shape
    blk = _pick_tile(S, (512, 256, 128, 64, 32, 16, 8))
    kernel = functools.partial(_flash_attn_kernel, blk=blk, scale_inv=scale_inv)

    q_spec = pl.BlockSpec((None, None, blk, dk), lambda b, h, qi: (b, h, qi, 0))
    kv_spec = pl.BlockSpec((None, None, S, dk), lambda b, h, qi: (b, h, 0, 0))
    o_spec = pl.BlockSpec((None, None, blk, dk), lambda b, h, qi: (b, h, qi, 0))

    call = _flash_call(kernel, (B, H, S // blk), [q_spec, kv_spec, kv_spec], o_spec,
                       jax.ShapeDtypeStruct((B, H, S, dk), jnp.bfloat16), blk, dk)
    return call(q, k, v)


# ----------------------------------------------------------------------------
# Public entry point (matches CausalSelfAttention.forward, eval mode).
# ----------------------------------------------------------------------------
def causal_self_attention(x, wq, wk, wv, wo, *, n_heads):
    """x: (B, S, D) f32. wq/wk/wv/wo: (D, D) in PyTorch (out_features, in_features) layout."""
    B, S, D = x.shape
    assert D % n_heads == 0
    dk = D // n_heads
    scale_inv = 1.0 / math.sqrt(dk)

    # bf16 MXU operands; all accumulation inside the kernels is f32.
    x_bf = x.astype(jnp.bfloat16)
    w_qkv_t = jnp.concatenate([wq.T, wk.T, wv.T], axis=1).astype(jnp.bfloat16)  # (D, 3D)
    wo_t = wo.T.astype(jnp.bfloat16)                                            # (D, D)

    # Fused QKV projection: (B*S, D) @ (D, 3D) -> (B*S, 3D).
    qkv = _matmul(x_bf.reshape(B * S, D), w_qkv_t, out_dtype=jnp.bfloat16)

    if dk % 128 == 0:
        # Lane-dense heads: address heads purely via index_map; no wrapper transposes,
        # flash output is already in (B, S, D) layout for the output projection.
        ctx = _flash_attention_fused_layout(qkv.reshape(B, S, 3 * D),
                                            n_heads=n_heads, scale_inv=scale_inv)
        ctx2 = ctx.reshape(B * S, D)
    else:
        # TODO(synk): d_k < 128 heads are not lane-dense; pack two heads per block instead of
        # this wrapper-side layout transpose.
        qkv5 = qkv.reshape(B, S, 3, n_heads, dk).transpose(2, 0, 3, 1, 4)  # (3, B, H, S, dk)
        ctx = _flash_attention_bhsd(qkv5[0], qkv5[1], qkv5[2], scale_inv=scale_inv)
        ctx2 = ctx.transpose(0, 2, 1, 3).reshape(B * S, D)

    out = _matmul(ctx2, wo_t, out_dtype=jnp.float32)   # output projection (f32 out, as the module)
    return out.reshape(B, S, D)


# ----------------------------------------------------------------------------
# Plain-JAX reference (eval mode, dropout = identity).
# ----------------------------------------------------------------------------
def _reference(x, wq, wk, wv, wo, *, n_heads):
    B, S, D = x.shape
    dk = D // n_heads
    scale = math.sqrt(dk)

    def proj(w):  # nn.Linear(bias=False): x @ W.T
        return (x @ w.T).reshape(B, S, n_heads, dk).transpose(0, 2, 1, 3)

    Q, K, V = proj(wq), proj(wk), proj(wv)                  # (B, H, S, d_k)
    scores = jnp.einsum("bhqd,bhkd->bhqk", Q, K) / scale
    mask = jnp.tril(jnp.ones((S, S)))[None, None]
    scores = jnp.where(mask == 0, -1e9, scores)
    attn = jax.nn.softmax(scores, axis=-1)
    ctx = jnp.einsum("bhqk,bhkd->bhqd", attn, V)
    ctx = ctx.transpose(0, 2, 1, 3).reshape(B, S, D)
    return ctx @ wo.T


if __name__ == "__main__":
    def run_case(B, S, D, H, seed):
        key = jax.random.PRNGKey(seed)
        kx, kq, kk, kv, ko = jax.random.split(key, 5)
        x = jax.random.normal(kx, (B, S, D), dtype=jnp.float32)
        # PyTorch Linear shape convention: (out_features, in_features).
        bound = 1.0 / math.sqrt(D)
        wq = jax.random.uniform(kq, (D, D), jnp.float32, -bound, bound)
        wk = jax.random.uniform(kk, (D, D), jnp.float32, -bound, bound)
        wv = jax.random.uniform(kv, (D, D), jnp.float32, -bound, bound)
        wo = jax.random.uniform(ko, (D, D), jnp.float32, -bound, bound)

        out = jax.block_until_ready(causal_self_attention(x, wq, wk, wv, wo, n_heads=H))
        ref = _reference(x, wq, wk, wv, wo, n_heads=H)
        assert out.shape == (B, S, D)
        # bf16 MXU inputs => looser tolerance than the pure-f32 reference.
        assert jnp.allclose(out, ref, rtol=3e-2, atol=3e-2), (
            f"max abs err = {jnp.max(jnp.abs(out - ref))}")

    # Small-head fallback path (d_k = 8 < 128): wrapper-side head split/merge.
    run_case(B=2, S=32, D=64, H=8, seed=0)
    # Lane-dense path (d_k = 128): index_map head addressing, resident KV, 2 q-tiles
    # (exercises both the unmasked in-kernel KV loop and the masked diagonal chunk).
    run_case(B=1, S=1024, D=256, H=2, seed=1)

    print("KERNEL_OK")
</pallas_src>

<mosaic_0001>
module attributes {stable_mosaic.version = 11 : i64} {
  func.func @_matmul_kernel(%arg0: i32, %arg1: i32, %arg2: i32, %arg3: memref<64x64xbf16, #tpu.memory_space<vmem>>, %arg4: memref<64x192xbf16, #tpu.memory_space<vmem>>, %arg5: memref<64x192xbf16, #tpu.memory_space<vmem>>, %arg6: memref<64x192xf32, #tpu.memory_space<vmem>>) attributes {dimension_semantics = [#tpu.dimension_semantics<parallel>, #tpu.dimension_semantics<parallel>, #tpu.dimension_semantics<arbitrary>], iteration_bounds = array<i64: 1, 1, 1>, scalar_prefetch = 0 : i64, scratch_operands = 1 : i64, tpu.core_type = #tpu.core_type<tc>, window_params = [{transform_indices = @transform_0, window_bounds = array<i64: 64, 64>}, {transform_indices = @transform_1, window_bounds = array<i64: 64, 192>}, {transform_indices = @transform_2, window_bounds = array<i64: 64, 192>}]} {
    %c0_i32 = arith.constant 0 : i32
    %0 = arith.cmpi eq, %arg2, %c0_i32 : i32
    %1 = arith.extui %0 : i1 to i32
    %c0_i32_0 = arith.constant 0 : i32
    %2 = arith.cmpi ne, %1, %c0_i32_0 : i32
    scf.if %2 {
      %cst_10 = arith.constant 0.000000e+00 : f32
      %12 = vector.broadcast %cst_10 : f32 to vector<64x192xf32>
      %c0_11 = arith.constant 0 : index
      %c0_12 = arith.constant 0 : index
      %13 = vector.load %arg6[%c0_11, %c0_12] : memref<64x192xf32, #tpu.memory_space<vmem>>, vector<64x192xf32>
      tpu.vector_store %arg6[%c0_11, %c0_12], %12 {strides = array<i32>} : memref<64x192xf32, #tpu.memory_space<vmem>>, vector<64x192xf32>,
    } else {
    }
    %c0 = arith.constant 0 : index
    %c0_1 = arith.constant 0 : index
    %3 = vector.load %arg6[%c0, %c0_1] : memref<64x192xf32, #tpu.memory_space<vmem>>, vector<64x192xf32>
    %c0_2 = arith.constant 0 : index
    %c0_3 = arith.constant 0 : index
    %4 = vector.load %arg3[%c0_2, %c0_3] : memref<64x64xbf16, #tpu.memory_space<vmem>>, vector<64x64xbf16>
    %c0_4 = arith.constant 0 : index
    %c0_5 = arith.constant 0 : index
    %5 = vector.load %arg4[%c0_4, %c0_5] : memref<64x192xbf16, #tpu.memory_space<vmem>>, vector<64x192xbf16>
    %cst = arith.constant dense<0.000000e+00> : vector<64x192xf32>
    %6 = tpu.matmul %4, %5, %cst {dimension_numbers = #tpu.dot_dimension_numbers<[1], [0], [0], [1], [0, 0, 1, 1], [], []>} : vector<64x64xbf16>, vector<64x192xbf16>, vector<64x192xf32> -> vector<64x192xf32>
    %7 = arith.addf %3, %6 : vector<64x192xf32>
    %c0_6 = arith.constant 0 : index
    %c0_7 = arith.constant 0 : index
    %8 = vector.load %arg6[%c0_6, %c0_7] : memref<64x192xf32, #tpu.memory_space<vmem>>, vector<64x192xf32>
    tpu.vector_store %arg6[%c0_6, %c0_7], %7 {strides = array<i32>} : memref<64x192xf32, #tpu.memory_space<vmem>>, vector<64x192xf32>,
    %c0_i32_8 = arith.constant 0 : i32
    %9 = arith.cmpi eq, %arg2, %c0_i32_8 : i32
    %10 = arith.extui %9 : i1 to i32
    %c0_i32_9 = arith.constant 0 : i32
    %11 = arith.cmpi ne, %10, %c0_i32_9 : i32
    scf.if %11 {
      %c0_10 = arith.constant 0 : index
      %c0_11 = arith.constant 0 : index
      %12 = vector.load %arg6[%c0_10, %c0_11] : memref<64x192xf32, #tpu.memory_space<vmem>>, vector<64x192xf32>
      %13 = arith.truncf %12 : vector<64x192xf32> to vector<64x192xbf16>
      %c0_12 = arith.constant 0 : index
      %c0_13 = arith.constant 0 : index
      %14 = vector.load %arg5[%c0_12, %c0_13] : memref<64x192xbf16, #tpu.memory_space<vmem>>, vector<64x192xbf16>
      tpu.vector_store %arg5[%c0_12, %c0_13], %13 {strides = array<i32>} : memref<64x192xbf16, #tpu.memory_space<vmem>>, vector<64x192xbf16>,
    } else {
    }
    return
  }
  func.func @transform_0(%arg0: i32, %arg1: i32, %arg2: i32) -> (i32, i32) {
    %c0_i32 = arith.constant 0 : i32
    return %arg0, %arg2 : i32, i32
  }
  func.func @transform_1(%arg0: i32, %arg1: i32, %arg2: i32) -> (i32, i32) {
    %c0_i32 = arith.constant 0 : i32
    return %arg2, %arg1 : i32, i32
  }
  func.func @transform_2(%arg0: i32, %arg1: i32, %arg2: i32) -> (i32, i32) {
    %c0_i32 = arith.constant 0 : i32
    return %arg0, %arg1 : i32, i32
  }
}

</mosaic_0001>

<bundles_post_ra>
// kernel: tpu_custom_call.1
= control target key start
LH: loop header
LB: loop body
LE: loop exit
PB: predicated region body
PF: predicated region fallthrough
CT: control target
= control target key end

     0   :  { %7 = vsyncpa [#allocation4], 0  ;;  %s611_s0 = inlined_call_operand.hbm [shape: bf16[64,64], index: 0, kind: input, shape index: {}]   ;;  %s612_s1 = inlined_call_operand.hbm [shape: bf16[64,192], index: 1, kind: input, shape index: {}]   ;;  %s613_s2 = inlined_call_operand.hbm [shape: bf16[64,192], index: 2, kind: output, shape index: {}]  }
   0x1   :  { %8 = vsyncpa [#allocation7], 0 }
   0x2   :  { %9 = vsyncpa [#allocation5], 0  ;;  %s505_s9 = smov [#allocation3]   ;;  %s433_s13 = scalar_lea.hbm %s611_s0, 512 }
   0x3   :  { %s15_s10 = sshll.u32 %s505_s9, 4  ;;  %p434_p0 = scmp.ne.s32.totalorder %s611_s0, %s433_s13  ;;  %s16_s10 = int_to_ptr.vmem [resolvable:$true] %s15_s10 }
   0x4   :  { %p437_p1 = scmp.lt.u32.totalorder %s433_s13, %s611_s0 }
   0x6   :  { %p439_p2 = pnand %p437_p1, %p434_p0 }
   0x8   :  { %442 = shalt.err (!%p439_p2)
}
   0x9   :  { %s443_s18 = scalar_lea.vmem %s16_s10, 512  ;;  %p448_p4 = scmp.lt.s32.totalorder %s16_s10, %s16_s10 }
   0xa   :  { %p444_p3 = scmp.ne.s32.totalorder %s16_s10, %s443_s18  ;;  %p449_p5 = scmp.lt.s32.totalorder %s443_s18, %s443_s18 }
   0xc   :  { %p450_p6 = por %p449_p5, %p448_p4 }
   0xe   :  { %p451_p7 = pnand %p450_p6, %p444_p3 }
  0x10   :  { %454 = shalt.err (!%p451_p7)
}
  0x11   :  { %s506_s19 = smov 64   ;;  %s507_s20 = smov 4  }
  0x12   :  { %21 = dma.hbm_to_vmem [thread:$0]  %s611_s0, 512, %s16_s10, [#allocation4], %s506_s19, %s506_s19, %s507_s20  }
  0x13   :  { %s508_s23 = smov [#allocation6]   ;;  %s455_s27 = scalar_lea.hbm %s612_s1, 1024 }
  0x14   :  { %s27_s24 = sshll.u32 %s508_s23, 4  ;;  %p456_p8 = scmp.ne.s32.totalorder %s612_s1, %s455_s27  ;;  %s28_s24 = int_to_ptr.vmem [resolvable:$true] %s27_s24 }
  0x15   :  { %p459_p9 = scmp.lt.u32.totalorder %s455_s27, %s612_s1 }
  0x17   :  { %p461_p10 = pnand %p459_p9, %p456_p8 }
  0x19   :  { %464 = shalt.err (!%p461_p10)
}
  0x1a   :  { %s465_s4 = scalar_lea.vmem %s28_s24, 1024  ;;  %p470_p12 = scmp.lt.s32.totalorder %s28_s24, %s28_s24 }
  0x1b   :  { %p466_p11 = scmp.ne.s32.totalorder %s28_s24, %s465_s4  ;;  %p471_p13 = scmp.lt.s32.totalorder %s465_s4, %s465_s4 }
  0x1d   :  { %p472_p0 = por %p471_p13, %p470_p12 }
  0x1f   :  { %p473_p1 = pnand %p472_p0, %p466_p11 }
  0x21   :  { %476 = shalt.err (!%p473_p1)
}
  0x22   :  { %s509_s0 = smov 128   ;;  %s510_s5 = smov 8  }
  0x23   :  { %33 = dma.hbm_to_vmem [thread:$0]  %s612_s1, 1024, %s28_s24, [#allocation7], %s509_s0, %s509_s0, %s510_s5  }
  0x24   :  { %499 = dma.done.wait [#allocation4], 512  }
  0x25   :  { %500 = vsyncadd [#allocation4], 4294966784 }
  0x26   :  { %501 = dma.done.wait [#allocation7], 1024  }
  0x27   :  { %502 = vsyncadd [#allocation7], 4294966272  ;;  %vm46_vm0 = vcmask 523264   ;;  %v511_v0 = vmov 0   ;;  %v512_v1 = vmov 0.0   ;;  %v429_v10 = vld [vmem:[#allocation3] sm:$0xff]  }
  0x28   :  { %199 = vmatprep.mubr.bf16.mxu0 %v511_v0  ;;  %219 = vmatprep.mubr.bf16.mxu1 %v511_v0  ;;  %47 = vst.msk [vmem:[#allocation2 + $0x8] sm:$0xff] %vm46_vm0, %v512_v1  ;;  %49 = vst.msk [vmem:[#allocation2 + $0x18] sm:$0xff] %vm46_vm0, %v512_v1  ;;  %v417_v2 = vld [vmem:[#allocation6 + $0x4] ss:$8 sps:$4 sm:$0xff]   ;;  %v419_v3 = vld [vmem:[#allocation6] ss:$8 sps:$4 sm:$0xff]  }
  0x29   :  { %51 = vst.msk [vmem:[#allocation2 + $0x28] sm:$0xff] %vm46_vm0, %v512_v1  ;;  %53 = vst.msk [vmem:[#allocation2 + $0x38] sm:$0xff] %vm46_vm0, %v512_v1  ;;  %167 = vmatprep.subr.bf16.mxu0 %v417_v2  ;;  %400 = vmatprep.subr.bf16.mxu1 %v417_v2  ;;  %v420_v4 = vld [vmem:[#allocation6 + $0x14] ss:$8 sps:$4 sm:$0xff]   ;;  %v422_v5 = vld [vmem:[#allocation6 + $0x10] ss:$8 sps:$4 sm:$0xff]  }
  0x2a   :  { %55 = vst.msk [vmem:[#allocation2 + $0x48] sm:$0xff] %vm46_vm0, %v512_v1  ;;  %57 = vst.msk [vmem:[#allocation2 + $0x58] sm:$0xff] %vm46_vm0, %v512_v1  ;;  %168 = vmatpush1.bf16.msra.mxu0 %v419_v3  ;;  %404 = vmatpush1.bf16.msra.mxu1 %v419_v3  ;;  %v423_v6 = vld [vmem:[#allocation6 + $0x24] ss:$8 sps:$4 sm:$0xff]   ;;  %v425_v7 = vld [vmem:[#allocation6 + $0x20] ss:$8 sps:$4 sm:$0xff]  }
  0x2b   :  { %59 = vst.msk [vmem:[#allocation2 + $0x68] sm:$0xff] %vm46_vm0, %v512_v1  ;;  %61 = vst.msk [vmem:[#allocation2 + $0x78] sm:$0xff] %vm46_vm0, %v512_v1  ;;  %169 = vmatprep.subr.bf16.mxu0 %v420_v4  ;;  %401 = vmatprep.subr.bf16.mxu1 %v420_v4  ;;  %v426_v8 = vld [vmem:[#allocation6 + $0x34] ss:$8 sps:$4 sm:$0xff]   ;;  %v428_v9 = vld [vmem:[#allocation6 + $0x30] ss:$8 sps:$4 sm:$0xff]  }
  0x2c   :  { %v430_v11 = vld [vmem:[#allocation3 + $0x10] sm:$0xff]   ;;  %v431_v12 = vld [vmem:[#allocation3 + $0x8] sm:$0xff]   ;;  %v432_v13 = vld [vmem:[#allocation3 + $0x18] sm:$0xff]   ;;  %vm339_vm1 = vcmask 1043456   ;;  %vm340_vm2 = vcmask 523268   ;;  %s513_s1 = smov [#allocation8]  }
  0x2d   :  { %vm572_vm3 = vmor %vm340_vm2, %vm339_vm1  ;;  %s355_s8 = sshll.u32 %s513_s1, 4  ;;  %s356_s8 = int_to_ptr.vmem [resolvable:$true] %s355_s8 }
  0x2e   :  { %170 = vmatpush1.bf16.msra.mxu0 %v422_v5  ;;  %405 = vmatpush1.bf16.msra.mxu1 %v422_v5  ;;  %s477_s9 = scalar_lea.vmem %s356_s8, 1024  ;;  %p482_p3 = scmp.lt.s32.totalorder %s356_s8, %s356_s8 }
  0x2f   :  { %171 = vmatprep.subr.bf16.mxu0 %v423_v6  ;;  %402 = vmatprep.subr.bf16.mxu1 %v423_v6  ;;  %v63_v14 = vld [vmem:[#allocation2 + $0x8] sm:$0xff]  ;;  %v65_v20 = vld [vmem:[#allocation2 + $0x18] sm:$0xff]  ;;  %p478_p2 = scmp.ne.s32.totalorder %s356_s8, %s477_s9  ;;  %p483_p4 = scmp.lt.s32.totalorder %s477_s9, %s477_s9 }
  0x30   :  { %v67_v30 = vld [vmem:[#allocation2 + $0x28] sm:$0xff]  ;;  %v69_v36 = vld [vmem:[#allocation2 + $0x38] sm:$0xff] }
  0x31   :  { %v71_v15 = vld [vmem:[#allocation2 + $0x48] sm:$0xff]  ;;  %v73_v21 = vld [vmem:[#allocation2 + $0x58] sm:$0xff]  ;;  %p484_p5 = por %p483_p4, %p482_p3 }
  0x32   :  { %172 = vmatpush1.bf16.msra.mxu0 %v425_v7  ;;  %406 = vmatpush1.bf16.msra.mxu1 %v425_v7  ;;  %v75_v31 = vld [vmem:[#allocation2 + $0x68] sm:$0xff]  ;;  %v77_v37 = vld [vmem:[#allocation2 + $0x78] sm:$0xff] }
  0x33   :  { %173 = vmatprep.subr.bf16.mxu0 %v426_v8  ;;  %403 = vmatprep.subr.bf16.mxu1 %v426_v8  ;;  %p485_p6 = pnand %p484_p5, %p478_p2 }
  0x36   :  { %174 = vmatpush1.bf16.msra.mxu0 %v428_v9  ;;  %407 = vmatpush1.bf16.msra.mxu1 %v428_v9 }
  0x39   :  { %380 = vmatmul.mubr.msk.bf16.vlgmr.msra.gmra.mrb[0].mxu0 %vm46_vm0, %v429_v10  ;;  %382 = vmatmul.mubr.msk.bf16.vlgmr.msra.gmra.mrb[0].mxu1 %vm46_vm0, %v430_v11 }
  0x3a   :  { %209 = vmatprep.mubr.bf16.mxu0 %v511_v0  ;;  %229 = vmatprep.mubr.bf16.mxu1 %v511_v0 }
  0x41   :  { %381 = vmatmul.mubr.msk.bf16.gmra.mrb[4].mxu0 %vm46_vm0, %v431_v12  ;;  %383 = vmatmul.mubr.msk.bf16.gmra.mrb[4].mxu1 %vm46_vm0, %v432_v13 }
 0x10c   :  { %v201_v16 = vpop.f32.mrb[0].mxu0  ;;  %v221_v17 = vpop.f32.mrb[0].mxu1 }
 0x10d   :  { %v203_v18 = vpop.f32.mrb[1].mxu0  ;;  %v223_v19 = vpop.f32.mrb[1].mxu1 }
 0x10e   :  { %v241_v22 = vadd.f32 %v203_v18, %v63_v14  ;;  %v249_v23 = vadd.f32 %v223_v19, %v71_v15  ;;  %v205_v24 = vpop.f32.mrb[2].mxu0  ;;  %v225_v25 = vpop.f32.mrb[2].mxu1 }
 0x10f   :  { %v207_v26 = vpop.f32.mrb[3].mxu0  ;;  %v227_v27 = vpop.f32.mrb[3].mxu1 }
 0x110   :  { %257 = vst.msk [vmem:[#allocation2 + $0x8] sm:$0xff] %vm46_vm0, %v241_v22  ;;  %265 = vst.msk [vmem:[#allocation2 + $0x48] sm:$0xff] %vm46_vm0, %v249_v23  ;;  %v243_v28 = vadd.f32 %v207_v26, %v65_v20  ;;  %v251_v29 = vadd.f32 %v227_v27, %v73_v21 }
 0x112   :  { %259 = vst.msk [vmem:[#allocation2 + $0x18] sm:$0xff] %vm46_vm0, %v243_v28  ;;  %267 = vst.msk [vmem:[#allocation2 + $0x58] sm:$0xff] %vm46_vm0, %v251_v29 }
 0x114   :  { %v211_v32 = vpop.f32.mrb[4].mxu0  ;;  %v231_v33 = vpop.f32.mrb[4].mxu1 }
 0x115   :  { %v213_v34 = vpop.f32.mrb[5].mxu0  ;;  %v233_v35 = vpop.f32.mrb[5].mxu1 }
 0x116   :  { %v245_v38 = vadd.f32 %v213_v34, %v67_v30  ;;  %v253_v39 = vadd.f32 %v233_v35, %v75_v31  ;;  %v215_v40 = vpop.f32.mrb[6].mxu0  ;;  %v235_v41 = vpop.f32.mrb[6].mxu1 }
 0x117   :  { %v217_v42 = vpop.f32.mrb[7].mxu0  ;;  %v237_v43 = vpop.f32.mrb[7].mxu1  ;;  %v276_v44 = vld [vmem:[#allocation2 + $0x8] sm:$0xff] }
 0x118   :  { %v284_v45 = vld [vmem:[#allocation2 + $0x48] sm:$0xff]  ;;  %261 = vst.msk [vmem:[#allocation2 + $0x28] sm:$0xff] %vm46_vm0, %v245_v38  ;;  %269 = vst.msk [vmem:[#allocation2 + $0x68] sm:$0xff] %vm46_vm0, %v253_v39  ;;  %v247_v47 = vadd.f32 %v217_v42, %v69_v36  ;;  %v255_v48 = vadd.f32 %v237_v43, %v77_v37  ;;  %v392_v49 = vpack.c.bf16 %v276_v44, %v201_v16 }
 0x119   :  { %v396_v50 = vpack.c.bf16 %v284_v45, %v221_v17  ;;  %v278_v51 = vld [vmem:[#allocation2 + $0x18] sm:$0xff] }
 0x11a   :  { %v286_v52 = vld [vmem:[#allocation2 + $0x58] sm:$0xff]  ;;  %263 = vst.msk [vmem:[#allocation2 + $0x38] sm:$0xff] %vm46_vm0, %v247_v47  ;;  %271 = vst.msk [vmem:[#allocation2 + $0x78] sm:$0xff] %vm46_vm0, %v255_v48  ;;  %v393_v53 = vpack.c.bf16 %v278_v51, %v205_v24 }
 0x11b   :  { %v397_v54 = vpack.c.bf16 %v286_v52, %v225_v25  ;;  %342 = vst.msk [vmem:[#allocation8] sm:$0xff] %vm572_vm3, %v392_v49  ;;  %346 = vst.msk [vmem:[#allocation8 + $0x20] sm:$0xff] %vm572_vm3, %v396_v50 }
 0x11c   :  { %343 = vst.msk [vmem:[#allocation8 + $0x8] sm:$0xff] %vm572_vm3, %v393_v53 }
 0x11d   :  { %347 = vst.msk [vmem:[#allocation8 + $0x28] sm:$0xff] %vm572_vm3, %v397_v54 }
 0x11f   :  { %v280_v55 = vld [vmem:[#allocation2 + $0x28] sm:$0xff] }
 0x120   :  { %v288_v56 = vld [vmem:[#allocation2 + $0x68] sm:$0xff]  ;;  %v394_v57 = vpack.c.bf16 %v280_v55, %v211_v32 }
 0x121   :  { %v398_v58 = vpack.c.bf16 %v288_v56, %v231_v33  ;;  %v282_v59 = vld [vmem:[#allocation2 + $0x38] sm:$0xff] }
 0x122   :  { %v290_v60 = vld [vmem:[#allocation2 + $0x78] sm:$0xff]  ;;  %v395_v61 = vpack.c.bf16 %v282_v59, %v215_v40  ;;  %344 = vst.msk [vmem:[#allocation8 + $0x10] sm:$0xff] %vm572_vm3, %v394_v57 }
 0x123   :  { %v399_v62 = vpack.c.bf16 %v290_v60, %v235_v41  ;;  %348 = vst.msk [vmem:[#allocation8 + $0x30] sm:$0xff] %vm572_vm3, %v398_v58 }
 0x124   :  { %345 = vst.msk [vmem:[#allocation8 + $0x18] sm:$0xff] %vm572_vm3, %v395_v61 }
 0x125   :  { %349 = vst.msk [vmem:[#allocation8 + $0x38] sm:$0xff] %vm572_vm3, %v399_v62 }
 0x126   :  { %488 = shalt.err (!%p485_p6)
}
 0x127   :  { %s489_s12 = scalar_lea.hbm %s613_s2, 1024 }
 0x128   :  { %p490_p7 = scmp.ne.s32.totalorder %s613_s2, %s489_s12  ;;  %p493_p8 = scmp.lt.u32.totalorder %s489_s12, %s613_s2 }
 0x12a   :  { %p495_p9 = pnand %p493_p8, %p490_p7 }
 0x12c   :  { %498 = shalt.err (!%p495_p9)
}
 0x12d   :  { %361 = dma.vmem_to_hbm [thread:$0]  %s356_s8, 1024, %s613_s2, [#allocation5], %s509_s0, %s509_s0, %s510_s5  }
 0x12e   :  { %503 = dma.done.wait [#allocation5], 1024  }
 0x12f   :  { %504 = vsyncadd [#allocation5], 4294966272 }
 0x130   :  { %365 = vsyncpa [#allocation4], 1 }
 0x131   :  { %366 = vsyncpa [#allocation7], 1 }
 0x132   :  { %367 = vsyncpa [#allocation5], 1 }

</bundles_post_ra>
